<compile_context>
chip_gen: v5e
topology: v5e:2x2
jax: 0.10.0
libtpu: 0.0.40
codegen_flags: <defaults>
</compile_context>

<pallas_src>
import math
import functools

import jax
import jax.numpy as jnp
from jax.experimental import pallas as pl
from jax.experimental.pallas import tpu as pltpu

N_NODES = 8      # nodes in the graph
N_EDGES = 32     # directed edges
F = 32           # node feature multiplicity ("F x 0e")
A = 4            # node attr multiplicity   ("A x 0e", one-hot species)
R = 8            # edge radial-embedding size
H = 8            # invariant_neurons
NUM_LAYERS = 2   # num_layers
EPS = 1e-8       # NormActivation epsilon

_LOG2 = math.log(2.0)


def _ssp(x):
    """ShiftedSoftPlus."""
    return jax.nn.softplus(x) - _LOG2


def convnet_fused_kernel(x_ref, z_ref, eemb_ref, asrc_ref, adstT_ref,
                         wfc0_ref, wfc1_ref, wcomb_ref, w2_ref, nbias_ref,
                         out_ref, *, resnets):
    """Both ConvNet layers fused; activations stay VMEM-resident between layers.

    x_ref     [N, F]            node features
    z_ref     [N, A]            node attrs (one-hot species)
    eemb_ref  [E, R]            edge radial embedding
    asrc_ref  [E, N]            one_hot(edge_src)
    adstT_ref [N, E]            one_hot(edge_dst)^T
    wfc0_ref  [L, R, H]         radial-MLP layer 0   (scale 1/sqrt(R) folded in)
    wfc1_ref  [L, H, F]         radial-MLP layer 1   (scale 1/sqrt(H) folded in)
    wcomb_ref [L, F, (A+1)*F]   [linear_1 | self-connection FCTP] concatenated,
                                scales 1/sqrt(F) and 1/sqrt(F*A) folded in
    w2_ref    [L, F, F]         linear_2             (scale 1/sqrt(F) folded in)
    nbias_ref [L, 1, F]         NormActivation bias
    """
    x = x_ref[...]
    z = z_ref[...]
    eemb = eemb_ref[...]
    asrc = asrc_ref[...]
    adstT = adstT_ref[...]

    for layer in range(NUM_LAYERS):  # static unroll (NUM_LAYERS is tiny)
        # ---------------- InteractionBlock ----------------
        # radial MLP (FullyConnectedNet: R -> H -> tp.weight_numel, silu)
        h = jax.nn.silu(jnp.dot(eemb, wfc0_ref[layer],
                                preferred_element_type=jnp.float32))
        tpw = jnp.dot(h, wfc1_ref[layer],
                      preferred_element_type=jnp.float32)            # [E, F]

        # linear_1 + self-connection FCTP in ONE lane-dense matmul:
        #   comb[:, :F]              = x @ w1 / sqrt(F)
        #   comb[:, F+v*F:(v+2)*F]   = x @ wsc[v] / sqrt(F*A)
        comb = jnp.dot(x, wcomb_ref[layer],
                       preferred_element_type=jnp.float32)           # [N, (A+1)*F]
        x1 = comb[:, :F]
        sc = z[:, 0:1] * comb[:, F:2 * F]
        for v in range(1, A):  # A is tiny & static; select-sum over one-hot species
            sc = sc + z[:, v:v + 1] * comb[:, (v + 1) * F:(v + 2) * F]

        # gather x1[edge_src] (one-hot matmul), 'uvu' tensor product with l=0 edge
        # attrs (== 1, folded out), weighted per-edge by the radial-MLP output
        xs = jnp.dot(asrc, x1, preferred_element_type=jnp.float32)   # [E, F]
        msg = xs * tpw                                               # [E, F]

        # scatter-sum of messages onto destination nodes (one-hot^T matmul)
        agg = jnp.dot(adstT, msg, preferred_element_type=jnp.float32)  # [N, F]

        # linear_2 + self connection
        xnew = jnp.dot(agg, w2_ref[layer],
                       preferred_element_type=jnp.float32) + sc

        # ------------- NormActivation (norm nonlinearity, scalar irreps) -------------
        norms = jnp.maximum(jnp.abs(xnew), EPS)     # == sqrt(max(x^2, eps^2))
        scal = _ssp(norms + nbias_ref[layer]) * pl.reciprocal(norms, approx=True)
        y = xnew * scal

        if resnets[layer]:  # static per-layer flag (ConvNet.resnets[layer])
            y = y + x
        x = y

    out_ref[...] = x


def _full_spec(shape):
    nd = len(shape)
    return pl.BlockSpec(shape, lambda i, _nd=nd: (0,) * _nd)


def fold_and_stack_params(raw_params):
    """Fold 1/sqrt(fan_in) path norms into weights and stack across layers (host-side, once)."""
    wfc0s, wfc1s, wcombs, w2s, nbiases = [], [], [], [], []
    for (wfc0, wfc1, w1, w2, wsc, nbias) in raw_params:
        wfc0s.append(wfc0 / math.sqrt(R))
        wfc1s.append(wfc1 / math.sqrt(H))
        # wsc: [A, F, F] (v,u,w) -> [F, A*F] so (x @ wsc_flat)[n, v*F+w] = sum_u x[n,u] wsc[v,u,w]
        wsc_flat = jnp.transpose(wsc, (1, 0, 2)).reshape(F, A * F) / math.sqrt(F * A)
        wcombs.append(jnp.concatenate([w1 / math.sqrt(F), wsc_flat], axis=1))  # [F, (A+1)*F]
        w2s.append(w2 / math.sqrt(F))
        nbiases.append(nbias)
    return (jnp.stack(wfc0s), jnp.stack(wfc1s), jnp.stack(wcombs),
            jnp.stack(w2s), jnp.stack(nbiases))


def convnet_forward(data, asrc, adstT, stacked_params, resnets):
    """Mirrors ConvNet.forward (conv -> NormActivation -> optional resnet, per layer),
    with all layers fused into a single pallas_call."""
    x = data["node_features"]
    z = data["node_attrs"]
    eemb = data["edge_embedding"]
    wfc0s, wfc1s, wcombs, w2s, nbiases = stacked_params
    inputs = (x, z, eemb, asrc, adstT, wfc0s, wfc1s, wcombs, w2s, nbiases)
    kernel = functools.partial(convnet_fused_kernel, resnets=tuple(resnets))
    y = pl.pallas_call(
        kernel,
        out_shape=jax.ShapeDtypeStruct((N_NODES, F), jnp.float32),
        grid=(1,),
        in_specs=[_full_spec(a.shape) for a in inputs],
        out_specs=_full_spec((N_NODES, F)),
        input_output_aliases={0: 0},   # node_features buffer reused for the output
        compiler_params=pltpu.CompilerParams(dimension_semantics=("arbitrary",)),
    )(*inputs)
    out = dict(data)
    out["node_features"] = y
    return out


def reference_layer(x, z, eemb, asrc, adstT, sh, layer_params, resnet):
    """Pure-JAX reference of the original (un-fused, un-folded) math."""
    wfc0, wfc1, w1, w2, wsc, nbias = layer_params
    h = jax.nn.silu(eemb @ wfc0 / math.sqrt(R))
    tpw = h @ wfc1 / math.sqrt(H)
    sc = jnp.einsum("nu,nv,vuw->nw", x, z, wsc) / math.sqrt(F * A)
    x1 = x @ w1 / math.sqrt(F)
    msg = (asrc @ x1) * sh * tpw
    agg = adstT @ msg
    xnew = agg @ w2 / math.sqrt(F) + sc
    norms = jnp.sqrt(jnp.maximum(xnew * xnew, EPS * EPS))
    y = xnew * (jax.nn.softplus(norms + nbias) - _LOG2) / norms
    return y + x if resnet else y


if __name__ == "__main__":
    key = jax.random.PRNGKey(0)
    ks = jax.random.split(key, 8)

    # graph data (deterministic, synthetic)
    x = jax.random.normal(ks[0], (N_NODES, F), jnp.float32)
    species = jax.random.randint(ks[1], (N_NODES,), 0, A)
    z = jax.nn.one_hot(species, A, dtype=jnp.float32)
    edge_src = jax.random.randint(ks[2], (N_EDGES,), 0, N_NODES)
    edge_dst = jax.random.randint(ks[3], (N_EDGES,), 0, N_NODES)
    edge_index = jnp.stack([edge_dst, edge_src])                 # nequip: row0=dst, row1=src
    eemb = jax.random.normal(ks[4], (N_EDGES, R), jnp.float32)   # radial basis embedding
    sh = jnp.ones((N_EDGES, 1), jnp.float32)                     # l=0 spherical harmonics (==1)

    asrc = jax.nn.one_hot(edge_src, N_NODES, dtype=jnp.float32)      # [E, N]
    adstT = jax.nn.one_hot(edge_dst, N_NODES, dtype=jnp.float32).T   # [N, E]

    # deterministic per-layer parameters (shapes from the module's __init__)
    raw_params = []
    for layer in range(NUM_LAYERS):
        kk = jax.random.split(jax.random.fold_in(ks[5], layer), 5)
        wfc0 = jax.random.normal(kk[0], (R, H), jnp.float32)     # radial MLP layer 0
        wfc1 = jax.random.normal(kk[1], (H, F), jnp.float32)     # radial MLP -> tp.weight_numel
        w1 = jax.random.normal(kk[2], (F, F), jnp.float32)       # linear_1
        w2 = jax.random.normal(kk[3], (F, F), jnp.float32)       # linear_2
        wsc = jax.random.normal(kk[4], (A, F, F), jnp.float32)   # self-connection FCTP weights
        nbias = jnp.zeros((1, F), jnp.float32)                   # NormActivation bias (init 0)
        raw_params.append((wfc0, wfc1, w1, w2, wsc, nbias))

    stacked_params = jax.tree_util.tree_map(jax.block_until_ready,
                                            fold_and_stack_params(raw_params))

    # irreps identical across layers, but ConvNet default resnet=False -> no skip add
    resnets = [False] * NUM_LAYERS

    data = {"node_features": x, "node_attrs": z, "edge_index": edge_index,
            "edge_embedding": eemb, "edge_attrs": sh}

    out_data = convnet_forward(data, asrc, adstT, stacked_params, resnets)
    y = jax.block_until_ready(out_data["node_features"])

    # pure-JAX reference check (original per-layer formulation)
    y_ref = x
    for layer in range(NUM_LAYERS):
        y_ref = reference_layer(y_ref, z, eemb, asrc, adstT, sh,
                                raw_params[layer], resnets[layer])

    assert y.shape == (N_NODES, F)
    assert bool(jnp.all(jnp.isfinite(y)))
    assert bool(jnp.allclose(y, y_ref, rtol=5e-2, atol=5e-3)), float(jnp.max(jnp.abs(y - y_ref)))
    print("KERNEL_OK")
</pallas_src>

<mosaic_0001>
module attributes {stable_mosaic.version = 11 : i64} {
  func.func @convnet_fused_kernel(%arg0: i32, %arg1: memref<8x32xf32, #tpu.memory_space<vmem>>, %arg2: memref<8x4xf32, #tpu.memory_space<vmem>>, %arg3: memref<32x8xf32, #tpu.memory_space<vmem>>, %arg4: memref<32x8xf32, #tpu.memory_space<vmem>>, %arg5: memref<8x32xf32, #tpu.memory_space<vmem>>, %arg6: memref<2x8x8xf32, #tpu.memory_space<vmem>>, %arg7: memref<2x8x32xf32, #tpu.memory_space<vmem>>, %arg8: memref<2x32x160xf32, #tpu.memory_space<vmem>>, %arg9: memref<2x32x32xf32, #tpu.memory_space<vmem>>, %arg10: memref<2x1x32xf32, #tpu.memory_space<vmem>>, %arg11: memref<8x32xf32, #tpu.memory_space<vmem>>) attributes {dimension_semantics = [#tpu.dimension_semantics<arbitrary>], iteration_bounds = array<i64: 1>, scalar_prefetch = 0 : i64, scratch_operands = 0 : i64, tpu.core_type = #tpu.core_type<tc>, window_params = [{pipeline_mode = #tpu.pipeline_mode<synchronous>, transform_indices = @transform_0, window_bounds = array<i64: 8, 32>}, {pipeline_mode = #tpu.pipeline_mode<synchronous>, transform_indices = @transform_1, window_bounds = array<i64: 8, 4>}, {pipeline_mode = #tpu.pipeline_mode<synchronous>, transform_indices = @transform_2, window_bounds = array<i64: 32, 8>}, {pipeline_mode = #tpu.pipeline_mode<synchronous>, transform_indices = @transform_3, window_bounds = array<i64: 32, 8>}, {pipeline_mode = #tpu.pipeline_mode<synchronous>, transform_indices = @transform_4, window_bounds = array<i64: 8, 32>}, {pipeline_mode = #tpu.pipeline_mode<synchronous>, transform_indices = @transform_5, window_bounds = array<i64: 2, 8, 8>}, {pipeline_mode = #tpu.pipeline_mode<synchronous>, transform_indices = @transform_6, window_bounds = array<i64: 2, 8, 32>}, {pipeline_mode = #tpu.pipeline_mode<synchronous>, transform_indices = @transform_7, window_bounds = array<i64: 2, 32, 160>}, {pipeline_mode = #tpu.pipeline_mode<synchronous>, transform_indices = @transform_8, window_bounds = array<i64: 2, 32, 32>}, {pipeline_mode = #tpu.pipeline_mode<synchronous>, transform_indices = @transform_9, window_bounds = array<i64: 2, 1, 32>}, {pipeline_mode = #tpu.pipeline_mode<synchronous>, transform_indices = @transform_10, window_bounds = array<i64: 8, 32>}]} {
    %c0 = arith.constant 0 : index
    %c0_0 = arith.constant 0 : index
    %0 = vector.load %arg1[%c0, %c0_0] : memref<8x32xf32, #tpu.memory_space<vmem>>, vector<8x32xf32>
    %c0_1 = arith.constant 0 : index
    %c0_2 = arith.constant 0 : index
    %1 = vector.load %arg2[%c0_1, %c0_2] : memref<8x4xf32, #tpu.memory_space<vmem>>, vector<8x4xf32>
    %c0_3 = arith.constant 0 : index
    %c0_4 = arith.constant 0 : index
    %2 = vector.load %arg3[%c0_3, %c0_4] : memref<32x8xf32, #tpu.memory_space<vmem>>, vector<32x8xf32>
    %c0_5 = arith.constant 0 : index
    %c0_6 = arith.constant 0 : index
    %3 = vector.load %arg4[%c0_5, %c0_6] : memref<32x8xf32, #tpu.memory_space<vmem>>, vector<32x8xf32>
    %c0_7 = arith.constant 0 : index
    %c0_8 = arith.constant 0 : index
    %4 = vector.load %arg5[%c0_7, %c0_8] : memref<8x32xf32, #tpu.memory_space<vmem>>, vector<8x32xf32>
    %c0_9 = arith.constant 0 : index
    %c0_10 = arith.constant 0 : index
    %c0_11 = arith.constant 0 : index
    %5 = vector.load %arg6[%c0_9, %c0_10, %c0_11] : memref<2x8x8xf32, #tpu.memory_space<vmem>>, vector<1x8x8xf32>
    %6 = vector.shape_cast %5 : vector<1x8x8xf32> to vector<8x8xf32>
    %cst = arith.constant dense<0.000000e+00> : vector<32x8xf32>
    %7 = tpu.matmul %2, %6, %cst {dimension_numbers = #tpu.dot_dimension_numbers<[1], [0], [0], [1], [0, 0, 1, 1], [], []>} : vector<32x8xf32>, vector<8x8xf32>, vector<32x8xf32> -> vector<32x8xf32>
    %8 = arith.negf %7 : vector<32x8xf32>
    %9 = math.exp %8 : vector<32x8xf32>
    %cst_12 = arith.constant 1.000000e+00 : f32
    %10 = vector.broadcast %cst_12 : f32 to vector<32x8xf32>
    %11 = arith.addf %10, %9 : vector<32x8xf32>
    %12 = arith.divf %10, %11 : vector<32x8xf32>
    %13 = arith.mulf %7, %12 : vector<32x8xf32>
    %c0_13 = arith.constant 0 : index
    %c0_14 = arith.constant 0 : index
    %c0_15 = arith.constant 0 : index
    %14 = vector.load %arg7[%c0_13, %c0_14, %c0_15] : memref<2x8x32xf32, #tpu.memory_space<vmem>>, vector<1x8x32xf32>
    %15 = vector.shape_cast %14 : vector<1x8x32xf32> to vector<8x32xf32>
    %cst_16 = arith.constant dense<0.000000e+00> : vector<32x32xf32>
    %16 = tpu.matmul %13, %15, %cst_16 {dimension_numbers = #tpu.dot_dimension_numbers<[1], [0], [0], [1], [0, 0, 1, 1], [], []>} : vector<32x8xf32>, vector<8x32xf32>, vector<32x32xf32> -> vector<32x32xf32>
    %c0_17 = arith.constant 0 : index
    %c0_18 = arith.constant 0 : index
    %c0_19 = arith.constant 0 : index
    %17 = vector.load %arg8[%c0_17, %c0_18, %c0_19] : memref<2x32x160xf32, #tpu.memory_space<vmem>>, vector<1x32x160xf32>
    %18 = vector.shape_cast %17 : vector<1x32x160xf32> to vector<32x160xf32>
    %cst_20 = arith.constant dense<0.000000e+00> : vector<8x160xf32>
    %19 = tpu.matmul %0, %18, %cst_20 {dimension_numbers = #tpu.dot_dimension_numbers<[1], [0], [0], [1], [0, 0, 1, 1], [], []>} : vector<8x32xf32>, vector<32x160xf32>, vector<8x160xf32> -> vector<8x160xf32>
    %20 = vector.extract_strided_slice %19 {offsets = [0, 0], sizes = [8, 32], strides = [1, 1]} : vector<8x160xf32> to vector<8x32xf32>
    %21 = vector.extract_strided_slice %1 {offsets = [0, 0], sizes = [8, 1], strides = [1, 1]} : vector<8x4xf32> to vector<8x1xf32>
    %22 = vector.extract_strided_slice %19 {offsets = [0, 32], sizes = [8, 32], strides = [1, 1]} : vector<8x160xf32> to vector<8x32xf32>
    %23 = vector.broadcast %21 : vector<8x1xf32> to vector<8x32xf32>
    %24 = arith.mulf %23, %22 : vector<8x32xf32>
    %25 = vector.extract_strided_slice %1 {offsets = [0, 1], sizes = [8, 1], strides = [1, 1]} : vector<8x4xf32> to vector<8x1xf32>
    %26 = vector.extract_strided_slice %19 {offsets = [0, 64], sizes = [8, 32], strides = [1, 1]} : vector<8x160xf32> to vector<8x32xf32>
    %27 = vector.broadcast %25 : vector<8x1xf32> to vector<8x32xf32>
    %28 = arith.mulf %27, %26 : vector<8x32xf32>
    %29 = arith.addf %24, %28 : vector<8x32xf32>
    %30 = vector.extract_strided_slice %1 {offsets = [0, 2], sizes = [8, 1], strides = [1, 1]} : vector<8x4xf32> to vector<8x1xf32>
    %31 = vector.extract_strided_slice %19 {offsets = [0, 96], sizes = [8, 32], strides = [1, 1]} : vector<8x160xf32> to vector<8x32xf32>
    %32 = vector.broadcast %30 : vector<8x1xf32> to vector<8x32xf32>
    %33 = arith.mulf %32, %31 : vector<8x32xf32>
    %34 = arith.addf %29, %33 : vector<8x32xf32>
    %35 = vector.extract_strided_slice %1 {offsets = [0, 3], sizes = [8, 1], strides = [1, 1]} : vector<8x4xf32> to vector<8x1xf32>
    %36 = vector.extract_strided_slice %19 {offsets = [0, 128], sizes = [8, 32], strides = [1, 1]} : vector<8x160xf32> to vector<8x32xf32>
    %37 = vector.broadcast %35 : vector<8x1xf32> to vector<8x32xf32>
    %38 = arith.mulf %37, %36 : vector<8x32xf32>
    %39 = arith.addf %34, %38 : vector<8x32xf32>
    %cst_21 = arith.constant dense<0.000000e+00> : vector<32x32xf32>
    %40 = tpu.matmul %3, %20, %cst_21 {dimension_numbers = #tpu.dot_dimension_numbers<[1], [0], [0], [1], [0, 0, 1, 1], [], []>} : vector<32x8xf32>, vector<8x32xf32>, vector<32x32xf32> -> vector<32x32xf32>
    %41 = arith.mulf %40, %16 : vector<32x32xf32>
    %cst_22 = arith.constant dense<0.000000e+00> : vector<8x32xf32>
    %42 = tpu.matmul %4, %41, %cst_22 {dimension_numbers = #tpu.dot_dimension_numbers<[1], [0], [0], [1], [0, 0, 1, 1], [], []>} : vector<8x32xf32>, vector<32x32xf32>, vector<8x32xf32> -> vector<8x32xf32>
    %c0_23 = arith.constant 0 : index
    %c0_24 = arith.constant 0 : index
    %c0_25 = arith.constant 0 : index
    %43 = vector.load %arg9[%c0_23, %c0_24, %c0_25] : memref<2x32x32xf32, #tpu.memory_space<vmem>>, vector<1x32x32xf32>
    %44 = vector.shape_cast %43 : vector<1x32x32xf32> to vector<32x32xf32>
    %cst_26 = arith.constant dense<0.000000e+00> : vector<8x32xf32>
    %45 = tpu.matmul %42, %44, %cst_26 {dimension_numbers = #tpu.dot_dimension_numbers<[1], [0], [0], [1], [0, 0, 1, 1], [], []>} : vector<8x32xf32>, vector<32x32xf32>, vector<8x32xf32> -> vector<8x32xf32>
    %46 = arith.addf %45, %39 : vector<8x32xf32>
    %47 = math.absf %46 : vector<8x32xf32>
    %cst_27 = arith.constant 9.99999993E-9 : f32
    %48 = vector.broadcast %cst_27 : f32 to vector<8x32xf32>
    %49 = arith.maximumf %47, %48 : vector<8x32xf32>
    %c0_28 = arith.constant 0 : index
    %c0_29 = arith.constant 0 : index
    %c0_30 = arith.constant 0 : index
    %50 = vector.load %arg10[%c0_28, %c0_29, %c0_30] : memref<2x1x32xf32, #tpu.memory_space<vmem>>, vector<1x1x32xf32>
    %51 = vector.shape_cast %50 : vector<1x1x32xf32> to vector<1x32xf32>
    %52 = vector.broadcast %51 : vector<1x32xf32> to vector<8x32xf32>
    %53 = arith.addf %49, %52 : vector<8x32xf32>
    %cst_31 = arith.constant 0.000000e+00 : f32
    %54 = vector.broadcast %cst_31 : f32 to vector<8x32xf32>
    %55 = arith.maximumf %53, %54 : vector<8x32xf32>
    %56 = vector.broadcast %cst_31 : f32 to vector<8x32xf32>
    %57 = arith.subf %53, %56 : vector<8x32xf32>
    %58 = arith.cmpf one, %57, %57 : vector<8x32xf32>
    %59 = vector.broadcast %cst_31 : f32 to vector<8x32xf32>
    %60 = arith.addf %53, %59 : vector<8x32xf32>
    %61 = math.absf %57 : vector<8x32xf32>
    %cst_32 = arith.constant 0.000000e+00 : f32
    %62 = vector.broadcast %cst_32 : f32 to vector<8x32xf32>
    %63 = arith.subf %62, %61 : vector<8x32xf32>
    %64 = math.exp %63 : vector<8x32xf32>
    %65 = math.log1p %64 : vector<8x32xf32>
    %66 = arith.addf %55, %65 : vector<8x32xf32>
    %67 = arith.select %58, %60, %66 : vector<8x32xi1>, vector<8x32xf32>
    %cst_33 = arith.constant 0.693147182 : f32
    %68 = vector.broadcast %cst_33 : f32 to vector<8x32xf32>
    %69 = arith.subf %67, %68 : vector<8x32xf32>
    %70 = tpu.reciprocal %49 {approx = true} : vector<8x32xf32> -> vector<8x32xf32>
    %71 = arith.mulf %69, %70 : vector<8x32xf32>
    %72 = arith.mulf %46, %71 : vector<8x32xf32>
    %c1 = arith.constant 1 : index
    %c0_34 = arith.constant 0 : index
    %c0_35 = arith.constant 0 : index
    %73 = vector.load %arg6[%c1, %c0_34, %c0_35] : memref<2x8x8xf32, #tpu.memory_space<vmem>>, vector<1x8x8xf32>
    %74 = vector.shape_cast %73 : vector<1x8x8xf32> to vector<8x8xf32>
    %cst_36 = arith.constant dense<0.000000e+00> : vector<32x8xf32>
    %75 = tpu.matmul %2, %74, %cst_36 {dimension_numbers = #tpu.dot_dimension_numbers<[1], [0], [0], [1], [0, 0, 1, 1], [], []>} : vector<32x8xf32>, vector<8x8xf32>, vector<32x8xf32> -> vector<32x8xf32>
    %76 = arith.negf %75 : vector<32x8xf32>
    %77 = math.exp %76 : vector<32x8xf32>
    %cst_37 = arith.constant 1.000000e+00 : f32
    %78 = vector.broadcast %cst_37 : f32 to vector<32x8xf32>
    %79 = arith.addf %78, %77 : vector<32x8xf32>
    %80 = arith.divf %78, %79 : vector<32x8xf32>
    %81 = arith.mulf %75, %80 : vector<32x8xf32>
    %c1_38 = arith.constant 1 : index
    %c0_39 = arith.constant 0 : index
    %c0_40 = arith.constant 0 : index
    %82 = vector.load %arg7[%c1_38, %c0_39, %c0_40] : memref<2x8x32xf32, #tpu.memory_space<vmem>>, vector<1x8x32xf32>
    %83 = vector.shape_cast %82 : vector<1x8x32xf32> to vector<8x32xf32>
    %cst_41 = arith.constant dense<0.000000e+00> : vector<32x32xf32>
    %84 = tpu.matmul %81, %83, %cst_41 {dimension_numbers = #tpu.dot_dimension_numbers<[1], [0], [0], [1], [0, 0, 1, 1], [], []>} : vector<32x8xf32>, vector<8x32xf32>, vector<32x32xf32> -> vector<32x32xf32>
    %c1_42 = arith.constant 1 : index
    %c0_43 = arith.constant 0 : index
    %c0_44 = arith.constant 0 : index
    %85 = vector.load %arg8[%c1_42, %c0_43, %c0_44] : memref<2x32x160xf32, #tpu.memory_space<vmem>>, vector<1x32x160xf32>
    %86 = vector.shape_cast %85 : vector<1x32x160xf32> to vector<32x160xf32>
    %cst_45 = arith.constant dense<0.000000e+00> : vector<8x160xf32>
    %87 = tpu.matmul %72, %86, %cst_45 {dimension_numbers = #tpu.dot_dimension_numbers<[1], [0], [0], [1], [0, 0, 1, 1], [], []>} : vector<8x32xf32>, vector<32x160xf32>, vector<8x160xf32> -> vector<8x160xf32>
    %88 = vector.extract_strided_slice %87 {offsets = [0, 0], sizes = [8, 32], strides = [1, 1]} : vector<8x160xf32> to vector<8x32xf32>
    %89 = vector.extract_strided_slice %1 {offsets = [0, 0], sizes = [8, 1], strides = [1, 1]} : vector<8x4xf32> to vector<8x1xf32>
    %90 = vector.extract_strided_slice %87 {offsets = [0, 32], sizes = [8, 32], strides = [1, 1]} : vector<8x160xf32> to vector<8x32xf32>
    %91 = vector.broadcast %89 : vector<8x1xf32> to vector<8x32xf32>
    %92 = arith.mulf %91, %90 : vector<8x32xf32>
    %93 = vector.extract_strided_slice %1 {offsets = [0, 1], sizes = [8, 1], strides = [1, 1]} : vector<8x4xf32> to vector<8x1xf32>
    %94 = vector.extract_strided_slice %87 {offsets = [0, 64], sizes = [8, 32], strides = [1, 1]} : vector<8x160xf32> to vector<8x32xf32>
    %95 = vector.broadcast %93 : vector<8x1xf32> to vector<8x32xf32>
    %96 = arith.mulf %95, %94 : vector<8x32xf32>
    %97 = arith.addf %92, %96 : vector<8x32xf32>
    %98 = vector.extract_strided_slice %1 {offsets = [0, 2], sizes = [8, 1], strides = [1, 1]} : vector<8x4xf32> to vector<8x1xf32>
    %99 = vector.extract_strided_slice %87 {offsets = [0, 96], sizes = [8, 32], strides = [1, 1]} : vector<8x160xf32> to vector<8x32xf32>
    %100 = vector.broadcast %98 : vector<8x1xf32> to vector<8x32xf32>
    %101 = arith.mulf %100, %99 : vector<8x32xf32>
    %102 = arith.addf %97, %101 : vector<8x32xf32>
    %103 = vector.extract_strided_slice %1 {offsets = [0, 3], sizes = [8, 1], strides = [1, 1]} : vector<8x4xf32> to vector<8x1xf32>
    %104 = vector.extract_strided_slice %87 {offsets = [0, 128], sizes = [8, 32], strides = [1, 1]} : vector<8x160xf32> to vector<8x32xf32>
    %105 = vector.broadcast %103 : vector<8x1xf32> to vector<8x32xf32>
    %106 = arith.mulf %105, %104 : vector<8x32xf32>
    %107 = arith.addf %102, %106 : vector<8x32xf32>
    %cst_46 = arith.constant dense<0.000000e+00> : vector<32x32xf32>
    %108 = tpu.matmul %3, %88, %cst_46 {dimension_numbers = #tpu.dot_dimension_numbers<[1], [0], [0], [1], [0, 0, 1, 1], [], []>} : vector<32x8xf32>, vector<8x32xf32>, vector<32x32xf32> -> vector<32x32xf32>
    %109 = arith.mulf %108, %84 : vector<32x32xf32>
    %cst_47 = arith.constant dense<0.000000e+00> : vector<8x32xf32>
    %110 = tpu.matmul %4, %109, %cst_47 {dimension_numbers = #tpu.dot_dimension_numbers<[1], [0], [0], [1], [0, 0, 1, 1], [], []>} : vector<8x32xf32>, vector<32x32xf32>, vector<8x32xf32> -> vector<8x32xf32>
    %c1_48 = arith.constant 1 : index
    %c0_49 = arith.constant 0 : index
    %c0_50 = arith.constant 0 : index
    %111 = vector.load %arg9[%c1_48, %c0_49, %c0_50] : memref<2x32x32xf32, #tpu.memory_space<vmem>>, vector<1x32x32xf32>
    %112 = vector.shape_cast %111 : vector<1x32x32xf32> to vector<32x32xf32>
    %cst_51 = arith.constant dense<0.000000e+00> : vector<8x32xf32>
    %113 = tpu.matmul %110, %112, %cst_51 {dimension_numbers = #tpu.dot_dimension_numbers<[1], [0], [0], [1], [0, 0, 1, 1], [], []>} : vector<8x32xf32>, vector<32x32xf32>, vector<8x32xf32> -> vector<8x32xf32>
    %114 = arith.addf %113, %107 : vector<8x32xf32>
    %115 = math.absf %114 : vector<8x32xf32>
    %cst_52 = arith.constant 9.99999993E-9 : f32
    %116 = vector.broadcast %cst_52 : f32 to vector<8x32xf32>
    %117 = arith.maximumf %115, %116 : vector<8x32xf32>
    %c1_53 = arith.constant 1 : index
    %c0_54 = arith.constant 0 : index
    %c0_55 = arith.constant 0 : index
    %118 = vector.load %arg10[%c1_53, %c0_54, %c0_55] : memref<2x1x32xf32, #tpu.memory_space<vmem>>, vector<1x1x32xf32>
    %119 = vector.shape_cast %118 : vector<1x1x32xf32> to vector<1x32xf32>
    %120 = vector.broadcast %119 : vector<1x32xf32> to vector<8x32xf32>
    %121 = arith.addf %117, %120 : vector<8x32xf32>
    %cst_56 = arith.constant 0.000000e+00 : f32
    %122 = vector.broadcast %cst_56 : f32 to vector<8x32xf32>
    %123 = arith.maximumf %121, %122 : vector<8x32xf32>
    %124 = vector.broadcast %cst_56 : f32 to vector<8x32xf32>
    %125 = arith.subf %121, %124 : vector<8x32xf32>
    %126 = arith.cmpf one, %125, %125 : vector<8x32xf32>
    %127 = vector.broadcast %cst_56 : f32 to vector<8x32xf32>
    %128 = arith.addf %121, %127 : vector<8x32xf32>
    %129 = math.absf %125 : vector<8x32xf32>
    %cst_57 = arith.constant 0.000000e+00 : f32
    %130 = vector.broadcast %cst_57 : f32 to vector<8x32xf32>
    %131 = arith.subf %130, %129 : vector<8x32xf32>
    %132 = math.exp %131 : vector<8x32xf32>
    %133 = math.log1p %132 : vector<8x32xf32>
    %134 = arith.addf %123, %133 : vector<8x32xf32>
    %135 = arith.select %126, %128, %134 : vector<8x32xi1>, vector<8x32xf32>
    %cst_58 = arith.constant 0.693147182 : f32
    %136 = vector.broadcast %cst_58 : f32 to vector<8x32xf32>
    %137 = arith.subf %135, %136 : vector<8x32xf32>
    %138 = tpu.reciprocal %117 {approx = true} : vector<8x32xf32> -> vector<8x32xf32>
    %139 = arith.mulf %137, %138 : vector<8x32xf32>
    %140 = arith.mulf %114, %139 : vector<8x32xf32>
    %c0_59 = arith.constant 0 : index
    %c0_60 = arith.constant 0 : index
    %141 = vector.load %arg11[%c0_59, %c0_60] : memref<8x32xf32, #tpu.memory_space<vmem>>, vector<8x32xf32>
    tpu.vector_store %arg11[%c0_59, %c0_60], %140 {strides = array<i32>} : memref<8x32xf32, #tpu.memory_space<vmem>>, vector<8x32xf32>,
    return
  }
  func.func @transform_0(%arg0: i32) -> (i32, i32) {
    %c0_i32 = arith.constant 0 : i32
    %c0_i32_0 = arith.constant 0 : i32
    %c0_i32_1 = arith.constant 0 : i32
    return %c0_i32, %c0_i32_0 : i32, i32
  }
  func.func @transform_1(%arg0: i32) -> (i32, i32) {
    %c0_i32 = arith.constant 0 : i32
    %c0_i32_0 = arith.constant 0 : i32
    %c0_i32_1 = arith.constant 0 : i32
    return %c0_i32, %c0_i32_0 : i32, i32
  }
  func.func @transform_2(%arg0: i32) -> (i32, i32) {
    %c0_i32 = arith.constant 0 : i32
    %c0_i32_0 = arith.constant 0 : i32
    %c0_i32_1 = arith.constant 0 : i32
    return %c0_i32, %c0_i32_0 : i32, i32
  }
  func.func @transform_3(%arg0: i32) -> (i32, i32) {
    %c0_i32 = arith.constant 0 : i32
    %c0_i32_0 = arith.constant 0 : i32
    %c0_i32_1 = arith.constant 0 : i32
    return %c0_i32, %c0_i32_0 : i32, i32
  }
  func.func @transform_4(%arg0: i32) -> (i32, i32) {
    %c0_i32 = arith.constant 0 : i32
    %c0_i32_0 = arith.constant 0 : i32
    %c0_i32_1 = arith.constant 0 : i32
    return %c0_i32, %c0_i32_0 : i32, i32
  }
  func.func @transform_5(%arg0: i32) -> (i32, i32, i32) {
    %c0_i32 = arith.constant 0 : i32
    %c0_i32_0 = arith.constant 0 : i32
    %c0_i32_1 = arith.constant 0 : i32
    %c0_i32_2 = arith.constant 0 : i32
    return %c0_i32, %c0_i32_0, %c0_i32_1 : i32, i32, i32
  }
  func.func @transform_6(%arg0: i32) -> (i32, i32, i32) {
    %c0_i32 = arith.constant 0 : i32
    %c0_i32_0 = arith.constant 0 : i32
    %c0_i32_1 = arith.constant 0 : i32
    %c0_i32_2 = arith.constant 0 : i32
    return %c0_i32, %c0_i32_0, %c0_i32_1 : i32, i32, i32
  }
  func.func @transform_7(%arg0: i32) -> (i32, i32, i32) {
    %c0_i32 = arith.constant 0 : i32
    %c0_i32_0 = arith.constant 0 : i32
    %c0_i32_1 = arith.constant 0 : i32
    %c0_i32_2 = arith.constant 0 : i32
    return %c0_i32, %c0_i32_0, %c0_i32_1 : i32, i32, i32
  }
  func.func @transform_8(%arg0: i32) -> (i32, i32, i32) {
    %c0_i32 = arith.constant 0 : i32
    %c0_i32_0 = arith.constant 0 : i32
    %c0_i32_1 = arith.constant 0 : i32
    %c0_i32_2 = arith.constant 0 : i32
    return %c0_i32, %c0_i32_0, %c0_i32_1 : i32, i32, i32
  }
  func.func @transform_9(%arg0: i32) -> (i32, i32, i32) {
    %c0_i32 = arith.constant 0 : i32
    %c0_i32_0 = arith.constant 0 : i32
    %c0_i32_1 = arith.constant 0 : i32
    %c0_i32_2 = arith.constant 0 : i32
    return %c0_i32, %c0_i32_0, %c0_i32_1 : i32, i32, i32
  }
  func.func @transform_10(%arg0: i32) -> (i32, i32) {
    %c0_i32 = arith.constant 0 : i32
    %c0_i32_0 = arith.constant 0 : i32
    %c0_i32_1 = arith.constant 0 : i32
    return %c0_i32, %c0_i32_0 : i32, i32
  }
}

</mosaic_0001>

<bundles_post_ra>
// kernel: tpu_custom_call.1
= control target key start
LH: loop header
LB: loop body
LE: loop exit
PB: predicated region body
PF: predicated region fallthrough
CT: control target
= control target key end

     0   :  { %15 = vsyncpa [#allocation3], 0  ;;  %s1315_s0 = inlined_call_operand.hbm [shape: f32[8,32], index: 0, kind: input, shape index: {}, may-alias: {0,10}]   ;;  %s1316_s1 = inlined_call_operand.vmem [shape: f32[8,4], index: 1, kind: input, shape index: {}]   ;;  %s1317_s2 = inlined_call_operand.vmem [shape: f32[32,8], index: 2, kind: input, shape index: {}]   ;;  %s1318_s3 = inlined_call_operand.vmem [shape: f32[32,8], index: 3, kind: input, shape index: {}]   ;;  %s1319_s4 = inlined_call_operand.vmem [shape: f32[8,32], index: 4, kind: input, shape index: {}]   ;;  %s1320_s5 = inlined_call_operand.vmem [shape: f32[2,8,8], index: 5, kind: input, shape index: {}]   ;;  %s1321_s6 = inlined_call_operand.hbm [shape: f32[2,8,32], index: 6, kind: input, shape index: {}]   ;;  %s1322_s7 = inlined_call_operand.hbm [shape: f32[2,32,160], index: 7, kind: input, shape index: {}]   ;;  %s1323_s8 = inlined_call_operand.vmem [shape: f32[2,32,32], index: 8, kind: input, shape index: {}]   ;;  %s1324_s9 = inlined_call_operand.vmem [shape: f32[2,1,32], index: 9, kind: input, shape index: {}]   ;;  %s1325_s10 = inlined_call_operand.hbm [shape: f32[8,32], index: 10, kind: output, shape index: {}, may-alias: {0,10}]  }
   0x1   :  { %16 = vsyncpa [#allocation6], 0  ;;  %s43_s15 = sshll.u32 %s1321_s6, 4  ;;  %s44_s15 = int_to_ptr.hbm [resolvable:$true] %s43_s15 }
   0x2   :  { %17 = vsyncpa [#allocation4], 0  ;;  %s1048_s16 = smov [#allocation5]   ;;  %s23_s20 = sshll.u32 %s1315_s0, 4  ;;  %s24_s20 = int_to_ptr.hbm [resolvable:$true] %s23_s20 }
   0x3   :  { %s45_s17 = sshll.u32 %s1048_s16, 4  ;;  %s1049_s21 = smov 128   ;;  %s46_s17 = int_to_ptr.vmem [resolvable:$true] %s45_s17 }
   0x4   :  { %s1050_s22 = smov 8   ;;  %s1051_s23 = smov [#allocation2]  }
   0x5   :  { %51 = dma.hbm_to_vmem [thread:$0]  %s44_s15, 256, %s46_s17, [#allocation6], %s1049_s21, %s1049_s21, %s1050_s22  }
   0x6   :  { %s25_s24 = sshll.u32 %s1051_s23, 4  ;;  %s56_s27 = sshll.u32 %s1322_s7, 4  ;;  %s26_s24 = int_to_ptr.vmem [resolvable:$true] %s25_s24  ;;  %s57_s27 = int_to_ptr.hbm [resolvable:$true] %s56_s27 }
   0x7   :  { %28 = dma.hbm_to_vmem [thread:$0]  %s24_s20, 128, %s26_s24, [#allocation3]  }
   0x8   :  { %s1052_s6 = smov [#allocation7]   ;;  %s1053_s29 = smov 256  }
   0x9   :  { %s58_s28 = sshll.u32 %s1052_s6, 4  ;;  %s1054_s30 = smov 16   ;;  %s59_s28 = int_to_ptr.vmem [resolvable:$true] %s58_s28 }
   0xa   :  { %64 = dma.hbm_to_vmem [thread:$0]  %s57_s27, 2048, %s59_s28, [#allocation6], %s1053_s29, %s1053_s29, %s1054_s30  }
   0xb   :  { %1042 = dma.done.wait [#allocation3], 128  }
   0xc   :  { %1043 = vsyncadd [#allocation3], 4294967168 }
   0xd   :  { %1044 = dma.done.wait [#allocation6], 2304  }
   0xe   :  { %1045 = vsyncadd [#allocation6], 4294964992  ;;  %v1055_v0 = vmov 1   ;;  %v1056_v1 = vmov 3   ;;  %vm93_vm0 = vcmask 64512   ;;  %v92_v2 = vld [vmem:[%s1320_s5] sm:$0xff] }
   0xf   :  { %895 = vset.pattern.permute.xlu0 %v1055_v0  ;;  %897 = vset.pattern.permute.xlu1 %v1056_v1  ;;  %v263_v3 = vld [vmem:[#allocation7 + $0x30] sm:$0xff]  ;;  %v1133_v4 = vld [vmem:[%s1317_s2] sm:$0xff]  ;;  %v261_v5 = vld [vmem:[#allocation7 + $0x20] sm:$0xff]  ;;  %vm265_vm1 = vcmask 261120   ;;  %v1057_v15 = vmov 2   ;;  %v1058_v16 = vmov 0  }
  0x10   :  { %121 = vmatpush.msra.mxu0 %v92_v2  ;;  %281 = vmatpush.msra.mxu3 %v263_v3  ;;  %v259_v6 = vld [vmem:[#allocation7 + $0x10] sm:$0xff]  ;;  %v257_v7 = vld [vmem:[#allocation7] sm:$0xff]  ;;  %v82_v8 = vld [vmem:[%s1316_s1] sm:$0xff]  ;;  %s1059_s21 = smov 96   ;;  %s1060_s24 = smov 64  }
  0x11   :  { %832 = vmatmul.msk.f32.vlgmr.msra.gmra.mxu0 %vm93_vm0, %v1133_v4  ;;  %v81_v9 = vld [vmem:[#allocation2] sm:$0xff]  ;;  %316 = vperm.xlu0 %895, %v82_v8   ;;  %v264_v10 = vld [vmem:[#allocation7 + $0x38] sm:$0xff]  ;;  %v1143_v11 = vld [vmem:[%s1317_s2 + $0x8] sm:$0xff]  ;;  %s1061_s25 = smov 32   ;;  %s821_s6 = sshll.u32 %s1325_s10, 4  ;;  %s822_s6 = int_to_ptr.hbm [resolvable:$true] %s821_s6 }
  0x12   :  { %282 = vmatpush.msra.mxu3 %v261_v5  ;;  %336 = vperm.xlu1 %897, %v82_v8   ;;  %v262_v12 = vld [vmem:[#allocation7 + $0x28] sm:$0xff]  ;;  %v260_v13 = vld [vmem:[#allocation7 + $0x18] sm:$0xff]  ;;  %v1159_v18 = vld [vmem:[%s1317_s2 + $0x18] sm:$0xff] }
  0x13   :  { %v258_v14 = vld [vmem:[#allocation7 + $0x8] sm:$0xff]  ;;  %v1151_v17 = vld [vmem:[%s1317_s2 + $0x10] sm:$0xff]  ;;  %v215_v19 = vld [vmem:[#allocation5] sm:$0xff] }
  0x14   :  { %283 = vmatpush.msra.mxu3 %v259_v6  ;;  %243 = vmatpush.msra.mxu1 %v215_v19  ;;  %v1171_v27 = vld [vmem:[%s1318_s3] sm:$0xff]  ;;  %v1191_v38 = vld [vmem:[%s1318_s3 + $0x8] sm:$0xff]  ;;  %v1206_v55 = vld [vmem:[%s1318_s3 + $0x10] sm:$0xff] }
  0x15   :  { %v1214_v6 = vld [vmem:[%s1318_s3 + $0x18] sm:$0xff] }
  0x16   :  { %284 = vmatpush.msra.mxu3 %v257_v7 }
  0x17   :  { %844 = vmatmul.msk.f32.vlgmr.msra.gmra.mxu3 %vm265_vm1, %v81_v9 }
  0x18   :  { %301 = vmatpush.msrb.mxu3 %v264_v10 }
  0x19   :  { %833 = vmatmul.msk.f32.gmra.mxu0 %vm93_vm0, %v1143_v11  ;;  %896 = vset.pattern.permute.xlu0 %v1057_v15 }
  0x1a   :  { %302 = vmatpush.msrb.mxu3 %v262_v12  ;;  %326 = vperm.xlu0 %896, %v82_v8  }
  0x1b   :  { %898 = vset.pattern.permute.xlu1 %v1058_v16 }
  0x1c   :  { %303 = vmatpush.msrb.mxu3 %v260_v13  ;;  %311 = vperm.xlu1 %898, %v82_v8  }
  0x1e   :  { %304 = vmatpush.msrb.mxu3 %v258_v14 }
  0x1f   :  { %845 = vmatmul.msk.f32.vlgmr.msrb.gmra.mxu3 %vm265_vm1, %v81_v9 }
  0x21   :  { %834 = vmatmul.msk.f32.gmra.mxu0 %vm93_vm0, %v1151_v17 }
  0x22   :  { %899 = vset.pattern.permute.xlu0 %v1056_v1 }
  0x29   :  { %835 = vmatmul.msk.f32.gmra.mxu0 %vm93_vm0, %v1159_v18 }
  0x83   :  { %v1163_v22 = vpop.permute.xlu0 %316 }
  0x84   :  { %v1193_v39 = vpop.permute.xlu1 %336 }
  0x8c   :  { %v1183_v31 = vpop.permute.xlu0 %326 }
  0x8e   :  { %v123_v20 = vpop.f32.mrf.mxu0 }
  0x8f   :  { %v836_v21 = vmul.f32 -1.442695, %v123_v20 }
  0x91   :  { %902 = vpow2.f32 %v836_v21 }
  0x96   :  { %v1165_v23 = vpop.f32.mrf.mxu0 }
  0x97   :  { %v903_v24 = vpop.eup %902  ;;  %v837_v25 = vmul.f32 -1.442695, %v1165_v23 }
  0x98   :  { %v147_v26 = vadd.f32 1.0, %v903_v24 }
  0x99   :  { %904 = vpow2.f32 %v837_v25 }
  0x9a   :  { %906 = vrcp.f32 %v147_v26  ;;  %v1173_v28 = vpop.f32.mrf.mxu3  ;;  %v162_v43 = vand.u32 2147483648, %v147_v26  ;;  %v160_v45 = vand.u32 2147483647, %v147_v26  ;;  %vm156_vm3 = vweird.f32 %v147_v26 }
  0x9b   :  { %v319_v29 = vmul.f32 %v1163_v22, %v1173_v28  ;;  %372 = vmatpush.msra.mxu2 %v1173_v28  ;;  %v329_v37 = vmul.f32 %v1183_v31, %v1173_v28 }
  0x9c   :  { %846 = vmatmul.msk.f32.vlgmr.msra.gmra.mxu2 %vm93_vm0, %v1171_v27  ;;  %v163_v51 = vor.u32 1.1754944e-38, %v162_v43  ;;  %vm161_vm5 = vcmp.eq.f32.partialorder %v160_v45, 8.507059e+37 }
  0x9d   :  { %321 = vrot.lane.b32.xlu2 %v319_v29, %s1059_s21 }
  0x9e   :  { %v1181_v30 = vpop.f32.mrf.mxu0 }
  0x9f   :  { %v905_v32 = vpop.eup %904  ;;  %v838_v33 = vmul.f32 -1.442695, %v1181_v30 }
  0xa0   :  { %v907_v34 = vpop.eup %906  ;;  %v148_v35 = vadd.f32 1.0, %v905_v32 }
  0xa1   :  { %v152_v36 = vmul.f32 %v907_v34, %v147_v26  ;;  %908 = vpow2.f32 %v838_v33  ;;  %vm157_vm2 = vweird.f32 %v907_v34 }
  0xa2   :  { %910 = vrcp.f32 %v148_v35  ;;  %v306_v40 = vpop.f32.mrf.mxu3  ;;  %vm158_vm4 = vmor %vm156_vm3, %vm157_vm2  ;;  %v177_v59 = vand.u32 2147483648, %v148_v35  ;;  %v175_v61 = vand.u32 2147483647, %v148_v35  ;;  %vm171_vm7 = vweird.f32 %v148_v35 }
  0xa3   :  { %v153_v41 = vsub.f32 1.0, %v152_v36  ;;  %v339_v42 = vmul.f32 %v1193_v39, %v306_v40 }
  0xa4   :  { %847 = vmatmul.msk.f32.gmra.mxu2 %vm93_vm0, %v1191_v38  ;;  %v178_v1 = vor.u32 1.1754944e-38, %v177_v59  ;;  %vm176_vm9 = vcmp.eq.f32.partialorder %v175_v61, 8.507059e+37  ;;  %v416_v59 = vld [vmem:[%s1323_s8 + $0x18] sm:$0xff]  ;;  %v414_v61 = vld [vmem:[%s1323_s8 + $0x8] sm:$0xff] }
  0xa5   :  { %v154_v44 = vmul.f32 %v907_v34, %v153_v41  ;;  %331 = vrot.lane.b32.xlu2 %v329_v37, %s1060_s24  ;;  %341 = vrot.lane.b32.xlu1 %v339_v42, %s1061_s25 }
  0xa6   :  { %v1200_v46 = vpop.f32.mrf.mxu0 }
  0xa7   :  { %v909_v47 = vpop.eup %908  ;;  %v155_v48 = vadd.f32 %v907_v34, %v154_v44  ;;  %v839_v49 = vmul.f32 -1.442695, %v1200_v46 }
  0xa8   :  { %v911_v50 = vpop.eup %910  ;;  %v149_v52 = vadd.f32 1.0, %v909_v47 }
  0xa9   :  { %v159_v53 = vsel %vm158_vm4, %v907_v34, %v155_v48  ;;  %v167_v54 = vmul.f32 %v911_v50, %v148_v35  ;;  %912 = vpow2.f32 %v839_v49  ;;  %vm172_vm6 = vweird.f32 %v911_v50 }
  0xaa   :  { %v164_v56 = vsel %vm161_vm5, %v163_v51, %v159_v53  ;;  %914 = vrcp.f32 %v149_v52  ;;  %vm173_vm8 = vmor %vm171_vm7, %vm172_vm6  ;;  %v192_v10 = vand.u32 2147483648, %v149_v52  ;;  %v190_v13 = vand.u32 2147483647, %v149_v52 }
  0xab   :  { %v211_v57 = vmul.f32 %v164_v56, %v123_v20  ;;  %v168_v58 = vsub.f32 1.0, %v167_v54  ;;  %vm186_vm11 = vweird.f32 %v149_v52 }
  0xac   :  { %848 = vmatmul.msk.f32.gmra.mxu2 %vm93_vm0, %v1206_v55  ;;  %v193_v16 = vor.u32 1.1754944e-38, %v192_v10  ;;  %vm191_vm13 = vcmp.eq.f32.partialorder %v190_v13, 8.507059e+37 }
  0xad   :  { %v169_v60 = vmul.f32 %v911_v50, %v168_v58  ;;  %840 = vmatmul.msk.f32.vlgmr.msra.gmra.mxu1 %vm93_vm0, %v211_v57  ;;  %v1232_v58 = vld [vmem:[%s1319_s4] sm:$0xff] }
  0xaf   :  { %v913_v62 = vpop.eup %912  ;;  %v170_v63 = vadd.f32 %v911_v50, %v169_v60  ;;  %v415_v60 = vld [vmem:[%s1323_s8 + $0x10] sm:$0xff] }
  0xb0   :  { %v915_v0 = vpop.eup %914  ;;  %v150_v2 = vadd.f32 1.0, %v913_v62  ;;  %v413_v62 = vld [vmem:[%s1323_s8] sm:$0xff] }
  0xb1   :  { %v174_v3 = vsel %vm173_vm8, %v911_v50, %v170_v63  ;;  %v182_v5 = vmul.f32 %v915_v0, %v149_v52  ;;  %vm187_vm10 = vweird.f32 %v915_v0 }
  0xb2   :  { %v179_v7 = vsel %vm176_vm9, %v178_v1, %v174_v3  ;;  %916 = vrcp.f32 %v150_v2  ;;  %vm188_vm12 = vmor %vm186_vm11, %vm187_vm10  ;;  %v207_v25 = vand.u32 2147483648, %v150_v2  ;;  %v205_v29 = vand.u32 2147483647, %v150_v2 }
  0xb3   :  { %v212_v8 = vmul.f32 %v179_v7, %v1165_v23  ;;  %v183_v9 = vsub.f32 1.0, %v182_v5  ;;  %vm201_vm15 = vweird.f32 %v150_v2  ;;  %v900_v7 = vld [vmem:[%s1324_s9] ss:$0 sm:$0xff] }
  0xb4   :  { %849 = vmatmul.msk.f32.gmra.mxu2 %vm93_vm0, %v1214_v6  ;;  %v208_v33 = vor.u32 1.1754944e-38, %v207_v25  ;;  %vm206_vm3 = vcmp.eq.f32.partialorder %v205_v29, 8.507059e+37 }
  0xb5   :  { %v184_v12 = vmul.f32 %v915_v0, %v183_v9  ;;  %841 = vmatmul.msk.f32.gmra.mxu1 %vm93_vm0, %v212_v8  ;;  %v634_v8 = vld [vmem:[#allocation7 + $0x70] sm:$0xff] }
  0xb6   :  { %651 = vmatpush.msrb.mxu1 %v634_v8 }
  0xb7   :  { %v185_v14 = vadd.f32 %v915_v0, %v184_v12 }
  0xb8   :  { %v917_v15 = vpop.eup %916 }
  0xb9   :  { %v189_v19 = vsel %vm188_vm12, %v915_v0, %v185_v14  ;;  %v197_v20 = vmul.f32 %v917_v15, %v150_v2  ;;  %vm202_vm14 = vweird.f32 %v917_v15  ;;  %v853_v0 = vld [vmem:[%s1320_s5 + $0x8] sm:$0xff]  ;;  %v633_v14 = vld [vmem:[#allocation7 + $0x68] sm:$0xff] }
  0xba   :  { %v194_v21 = vsel %vm191_vm13, %v193_v16, %v189_v19  ;;  %vm203_vm2 = vmor %vm201_vm15, %vm202_vm14  ;;  %v631_v16 = vld [vmem:[#allocation7 + $0x58] sm:$0xff]  ;;  %v629_v19 = vld [vmem:[#allocation7 + $0x48] sm:$0xff] }
  0xbb   :  { %v213_v23 = vmul.f32 %v194_v21, %v1181_v30  ;;  %v198_v24 = vsub.f32 1.0, %v197_v20  ;;  %v1224_v30 = vpop.permute.xlu1 %311 }
  0xbc   :  { %v314_v40 = vmul.f32 %v1224_v30, %v1173_v28 }
  0xbd   :  { %v199_v26 = vmul.f32 %v917_v15, %v198_v24  ;;  %842 = vmatmul.msk.f32.gmra.mxu1 %vm93_vm0, %v213_v23 }
  0xbf   :  { %v200_v32 = vadd.f32 %v917_v15, %v199_v26 }
  0xc1   :  { %v204_v34 = vsel %vm203_vm2, %v917_v15, %v200_v32 }
  0xc2   :  { %v209_v35 = vsel %vm206_vm3, %v208_v33, %v204_v34 }
  0xc3   :  { %v214_v36 = vmul.f32 %v209_v35, %v1200_v46 }
  0xc5   :  { %843 = vmatmul.msk.f32.gmra.mxu1 %vm93_vm0, %v214_v36 }
  0xf7   :  { %v322_v37 = vpop.permute.xlu2 %321 }
  0xf8   :  { %v324_v42 = vadd.f32 %v322_v37, %v314_v40 }
  0xff   :  { %v332_v41 = vpop.permute.xlu2 %331 }
 0x100   :  { %v334_v43 = vadd.f32 %v332_v41, %v324_v42 }
 0x117   :  { %v342_v44 = vpop.permute.xlu1 %341 }
 0x118   :  { %v344_v45 = vadd.f32 %v342_v44, %v334_v43 }
 0x11a   :  { %418 = vrot.lane.b32.xlu2 %v344_v45, %s1059_s21 }
 0x11f   :  { %v374_v47 = vpop.f32.mrf.mxu2 }
 0x127   :  { %v377_v49 = vpop.f32.mrf.mxu2 }
 0x12a   :  { %v245_v48 = vpop.f32.mrf.mxu1 }
 0x12b   :  { %v386_v28 = vmul.f32 %v374_v47, %v245_v48 }
 0x12f   :  { %v380_v46 = vpop.f32.mrf.mxu2 }
 0x132   :  { %v248_v50 = vpop.f32.mrf.mxu1 }
 0x133   :  { %v387_v57 = vmul.f32 %v377_v49, %v248_v50 }
 0x137   :  { %v383_v52 = vpop.f32.mrf.mxu2 }
 0x13a   :  { %v251_v51 = vpop.f32.mrf.mxu1 }
 0x13b   :  { %v388_v56 = vmul.f32 %v380_v46, %v251_v51 }
 0x142   :  { %v254_v53 = vpop.f32.mrf.mxu1 }
 0x143   :  { %v389_v54 = vmul.f32 %v383_v52, %v254_v53 }
 0x145   :  { %405 = vmatpush.msra.mxu3 %v389_v54 }
 0x147   :  { %406 = vmatpush.msra.mxu3 %v388_v56 }
 0x149   :  { %407 = vmatpush.msra.mxu3 %v387_v57 }
 0x14b   :  { %408 = vmatpush.msra.mxu3 %v386_v28 }
 0x14c   :  { %850 = vmatmul.msk.f32.vlgmr.msra.gmra.mxu3 %vm265_vm1, %v1232_v58 }
 0x14d   :  { %436 = vmatpush.msrb.mxu3 %v416_v59 }
 0x14f   :  { %437 = vmatpush.msrb.mxu3 %v415_v60 }
 0x151   :  { %438 = vmatpush.msrb.mxu3 %v414_v61 }
 0x153   :  { %439 = vmatpush.msrb.mxu3 %v413_v62 }
 0x155   :  { %490 = vmatpush.msra.mxu3 %v853_v0 }
 0x174   :  { %v419_v1 = vpop.permute.xlu2 %418 }
 0x1cf   :  { %v410_v63 = vpop.f32.mrf.mxu3 }
 0x1d0   :  { %851 = vmatmul.msk.f32.vlgmr.msrb.gmra.mxu3 %vm265_vm1, %v410_v63 }
 0x1d8   :  { %854 = vmatmul.msk.f32.vlgmr.msra.gmra.mxu3 %vm93_vm0, %v1133_v4  ;;  %v632_v4 = vld [vmem:[#allocation7 + $0x60] sm:$0xff] }
 0x1d9   :  { %652 = vmatpush.msrb.mxu1 %v632_v4 }
 0x1e0   :  { %855 = vmatmul.msk.f32.gmra.mxu3 %vm93_vm0, %v1143_v11  ;;  %v630_v11 = vld [vmem:[#allocation7 + $0x50] sm:$0xff] }
 0x1e1   :  { %653 = vmatpush.msrb.mxu1 %v630_v11  ;;  %v585_v11 = vld [vmem:[#allocation5 + $0x8] sm:$0xff] }
 0x1e2   :  { %613 = vmatpush.msrb.mxu0 %v585_v11  ;;  %v901_v11 = vld [vmem:[%s1324_s9 + $0x1] ss:$0 sm:$0xff] }
 0x1e8   :  { %856 = vmatmul.msk.f32.gmra.mxu3 %vm93_vm0, %v1151_v17  ;;  %v628_v17 = vld [vmem:[#allocation7 + $0x40] sm:$0xff] }
 0x1e9   :  { %654 = vmatpush.msrb.mxu1 %v628_v17 }
 0x1f0   :  { %857 = vmatmul.msk.f32.gmra.mxu3 %vm93_vm0, %v1159_v18  ;;  %v635_v18 = vld [vmem:[#allocation7 + $0x78] sm:$0xff] }
 0x1f1   :  { %671 = vmatpush.msra.mxu1 %v635_v18 }
 0x1f3   :  { %672 = vmatpush.msra.mxu1 %v633_v14 }
 0x1f5   :  { %673 = vmatpush.msra.mxu1 %v631_v16 }
 0x1f7   :  { %674 = vmatpush.msra.mxu1 %v629_v19 }
 0x253   :  { %v441_v2 = vpop.f32.mrf.mxu3 }
 0x254   :  { %v442_v3 = vadd.f32 %v441_v2, %v419_v1 }
 0x256   :  { %v444_v5 = vand.u32 2147483647, %v442_v3 }
 0x258   :  { %v445_v9 = vmax.f32 %v444_v5, 1e-08 }
 0x25a   :  { %v450_v10 = vadd.f32 %v900_v7, %v445_v9 }
 0x25b   :  { %v492_v43 = vpop.f32.mrf.mxu3 }
 0x25c   :  { %v454_v12 = vand.u32 2147483647, %v450_v10  ;;  %v451_v33 = vmax.f32 %v450_v10, 0.0  ;;  %vm452_vm5 = vcmp.ne.f32.partialorder %v450_v10, %v450_v10  ;;  %v858_v44 = vmul.f32 -1.442695, %v492_v43 }
 0x25e   :  { %v455_v13 = vsub.f32 0.0, %v454_v12 }
 0x260   :  { %v456_v15 = vmul.f32 1.442695, %v455_v13 }
 0x262   :  { %918 = vpow2.f32 %v456_v15 }
 0x263   :  { %v495_v45 = vpop.f32.mrf.mxu3 }
 0x264   :  { %v859_v48 = vmul.f32 -1.442695, %v495_v45 }
 0x268   :  { %v919_v20 = vpop.eup %918 }
 0x269   :  { %v458_v21 = vadd.f32 1.0, %v919_v20  ;;  %v461_v23 = vmul.f32 -0.5, %v919_v20  ;;  %v464_v25 = vand.u32 2147483647, %v919_v20 }
 0x26b   :  { %920 = vlog2.f32 %v458_v21  ;;  %v462_v24 = vadd.f32 1.0, %v461_v23  ;;  %vm465_vm4 = vcmp.lt.f32.partialorder %v464_v25, 0.0004427343  ;;  %v1265_v50 = vpop.f32.mrf.mxu3 }
 0x26c   :  { %922 = vrcp.f32 %v445_v9  ;;  %v860_v51 = vmul.f32 -1.442695, %v1265_v50 }
 0x26d   :  { %v463_v32 = vmul.f32 %v919_v20, %v462_v24  ;;  %924 = vpow2.f32 %v858_v44 }
 0x26e   :  { %926 = vpow2.f32 %v859_v48 }
 0x271   :  { %v921_v26 = vpop.eup %920 }
 0x272   :  { %v460_v29 = vmul.f32 0.6931472, %v921_v26  ;;  %v923_v40 = vpop.eup %922 }
 0x273   :  { %v925_v47 = vpop.eup %924  ;;  %v1268_v61 = vpop.f32.mrf.mxu3 }
 0x274   :  { %v466_v34 = vsel %vm465_vm4, %v463_v32, %v460_v29  ;;  %v516_v49 = vadd.f32 1.0, %v925_v47  ;;  %v927_v46 = vpop.eup %926  ;;  %v861_v0 = vmul.f32 -1.442695, %v1268_v61 }
 0x275   :  { %v467_v35 = vadd.f32 %v466_v34, %v451_v33  ;;  %v517_v53 = vadd.f32 1.0, %v927_v46 }
 0x276   :  { %928 = vrcp.f32 %v516_v49  ;;  %v531_v56 = vand.u32 2147483648, %v516_v49  ;;  %vm525_vm6 = vweird.f32 %v516_v49  ;;  %v529_v28 = vand.u32 2147483647, %v516_v49 }
 0x277   :  { %v468_v36 = vsel %vm452_vm5, %v450_v10, %v467_v35  ;;  %930 = vpow2.f32 %v860_v51  ;;  %vm540_vm10 = vweird.f32 %v517_v53  ;;  %v546_v8 = vand.u32 2147483648, %v517_v53 }
 0x278   :  { %v852_v37 = vadd.f32 -0.6931472, %v468_v36  ;;  %932 = vrcp.f32 %v517_v53  ;;  %v532_v60 = vor.u32 1.1754944e-38, %v531_v56  ;;  %vm530_vm9 = vcmp.eq.f32.partialorder %v529_v28, 8.507059e+37 }
 0x279   :  { %934 = vpow2.f32 %v861_v0  ;;  %v544_v10 = vand.u32 2147483647, %v517_v53  ;;  %v547_v17 = vor.u32 1.1754944e-38, %v546_v8 }
 0x27a   :  { %v471_v41 = vmul.f32 %v923_v40, %v852_v37 }
 0x27b   :  { %vm545_vm13 = vcmp.eq.f32.partialorder %v544_v10, 8.507059e+37 }
 0x27c   :  { %v472_v42 = vmul.f32 %v471_v41, %v442_v3  ;;  %v929_v52 = vpop.eup %928 }
 0x27d   :  { %v521_v54 = vmul.f32 %v929_v52, %v516_v49  ;;  %vm526_vm7 = vweird.f32 %v929_v52  ;;  %v931_v62 = vpop.eup %930 }
 0x27e   :  { %866 = vmatmul.msk.f32.vlgmr.msrb.gmra.mxu1 %vm265_vm1, %v472_v42  ;;  %vm527_vm8 = vmor %vm525_vm6, %vm526_vm7  ;;  %v933_v1 = vpop.eup %932  ;;  %v518_v2 = vadd.f32 1.0, %v931_v62 }
 0x27f   :  { %v522_v57 = vsub.f32 1.0, %v521_v54  ;;  %v536_v5 = vmul.f32 %v933_v1, %v517_v53  ;;  %vm541_vm11 = vweird.f32 %v933_v1  ;;  %v935_v13 = vpop.eup %934 }
 0x280   :  { %936 = vrcp.f32 %v518_v2  ;;  %vm542_vm12 = vmor %vm540_vm10, %vm541_vm11  ;;  %v519_v15 = vadd.f32 1.0, %v935_v13  ;;  %vm555_vm14 = vweird.f32 %v518_v2  ;;  %v561_v21 = vand.u32 2147483648, %v518_v2 }
 0x281   :  { %v523_v59 = vmul.f32 %v929_v52, %v522_v57  ;;  %v537_v4 = vsub.f32 1.0, %v536_v5  ;;  %v559_v25 = vand.u32 2147483647, %v518_v2  ;;  %v874_v5 = vld [vmem:[%s1323_s8 + $0x28] sm:$0xff] }
 0x282   :  { %938 = vrcp.f32 %v519_v15  ;;  %v562_v29 = vor.u32 1.1754944e-38, %v561_v21  ;;  %vm570_vm4 = vweird.f32 %v519_v15  ;;  %v574_v44 = vand.u32 2147483647, %v519_v15 }
 0x283   :  { %v524_v63 = vadd.f32 %v929_v52, %v523_v59  ;;  %v538_v12 = vmul.f32 %v933_v1, %v537_v4  ;;  %vm560_vm3 = vcmp.eq.f32.partialorder %v559_v25, 8.507059e+37 }
 0x284   :  { %vm575_vm7 = vcmp.eq.f32.partialorder %v574_v44, 8.507059e+37 }
 0x285   :  { %v528_v3 = vsel %vm527_vm8, %v929_v52, %v524_v63  ;;  %v539_v18 = vadd.f32 %v933_v1, %v538_v12 }
 0x286   :  { %867 = vmatmul.msk.f32.vlgmr.msra.gmra.mxu1 %vm265_vm1, %v472_v42  ;;  %v533_v7 = vsel %vm530_vm9, %v532_v60, %v528_v3  ;;  %v937_v14 = vpop.eup %936  ;;  %v576_v42 = vand.u32 2147483648, %v519_v15  ;;  %v875_v3 = vld [vmem:[%s1323_s8 + $0x30] sm:$0xff] }
 0x287   :  { %v580_v9 = vmul.f32 %v533_v7, %v492_v43  ;;  %v543_v16 = vsel %vm542_vm12, %v933_v1, %v539_v18  ;;  %v551_v19 = vmul.f32 %v937_v14, %v518_v2  ;;  %vm556_vm15 = vweird.f32 %v937_v14  ;;  %v876_v2 = vld [vmem:[%s1323_s8 + $0x38] sm:$0xff]  ;;  %v873_v7 = vld [vmem:[%s1323_s8 + $0x20] sm:$0xff]  ;;  %s1062_s8 = smov [#allocation8]  }
 0x288   :  { %v548_v20 = vsel %vm545_vm13, %v547_v17, %v543_v16  ;;  %vm557_vm2 = vmor %vm555_vm14, %vm556_vm15  ;;  %v939_v33 = vpop.eup %938  ;;  %s819_s9 = sshll.u32 %s1062_s8, 4  ;;  %s820_s9 = int_to_ptr.vmem [resolvable:$true] %s819_s9 }
 0x289   :  { %862 = vmatmul.msk.f32.vlgmr.msrb.gmra.mxu0 %vm93_vm0, %v580_v9  ;;  %v581_v23 = vmul.f32 %v548_v20, %v495_v45  ;;  %v552_v24 = vsub.f32 1.0, %v551_v19  ;;  %v566_v35 = vmul.f32 %v939_v33, %v519_v15  ;;  %vm571_vm5 = vweird.f32 %v939_v33 }
 0x28a   :  { %vm572_vm6 = vmor %vm570_vm4, %vm571_vm5  ;;  %v577_v45 = vor.u32 1.1754944e-38, %v576_v42 }
 0x28b   :  { %v553_v26 = vmul.f32 %v937_v14, %v552_v24  ;;  %v567_v40 = vsub.f32 1.0, %v566_v35 }
 0x28d   :  { %v554_v32 = vadd.f32 %v937_v14, %v553_v26  ;;  %v568_v41 = vmul.f32 %v939_v33, %v567_v40 }
 0x28f   :  { %v558_v34 = vsel %vm557_vm2, %v937_v14, %v554_v32  ;;  %v569_v43 = vadd.f32 %v939_v33, %v568_v41 }
 0x290   :  { %v563_v36 = vsel %vm560_vm3, %v562_v29, %v558_v34 }
 0x291   :  { %863 = vmatmul.msk.f32.gmra.mxu0 %vm93_vm0, %v581_v23  ;;  %v582_v37 = vmul.f32 %v563_v36, %v1265_v50  ;;  %v573_v47 = vsel %vm572_vm6, %v939_v33, %v569_v43 }
 0x292   :  { %v578_v48 = vsel %vm575_vm7, %v577_v45, %v573_v47 }
 0x293   :  { %v583_v49 = vmul.f32 %v578_v48, %v1268_v61 }
 0x299   :  { %864 = vmatmul.msk.f32.gmra.mxu0 %vm93_vm0, %v582_v37 }
 0x2a1   :  { %865 = vmatmul.msk.f32.gmra.mxu0 %vm93_vm0, %v583_v49 }
 0x2fb   :  { %v656_v46 = vpop.f32.mrf.mxu1 }
 0x2fc   :  { %713 = vmatpush.msrb.mxu2 %v656_v46  ;;  %v686_v50 = vmul.f32 %v656_v46, %v1183_v31  ;;  %v680_v51 = vmul.f32 %v656_v46, %v1163_v22  ;;  %v679_v22 = vmul.f32 %v656_v46, %v1224_v30 }
 0x2fd   :  { %868 = vmatmul.msk.f32.vlgmr.msrb.gmra.mxu2 %vm93_vm0, %v1171_v27 }
 0x2fe   :  { %688 = vrot.lane.b32.xlu1 %v686_v50, %s1060_s24  ;;  %682 = vrot.lane.b32.xlu0 %v680_v51, %s1059_s21 }
 0x303   :  { %v676_v52 = vpop.f32.mrf.mxu1 }
 0x304   :  { %v692_v53 = vmul.f32 %v676_v52, %v1193_v39 }
 0x305   :  { %869 = vmatmul.msk.f32.gmra.mxu2 %vm93_vm0, %v1191_v38 }
 0x306   :  { %694 = vrot.lane.b32.xlu2 %v692_v53, %s1061_s25  ;;  %v615_v39 = vpop.f32.mrf.mxu0 }
 0x30d   :  { %870 = vmatmul.msk.f32.gmra.mxu2 %vm93_vm0, %v1206_v55 }
 0x30e   :  { %v618_v59 = vpop.f32.mrf.mxu0 }
 0x315   :  { %871 = vmatmul.msk.f32.gmra.mxu2 %vm93_vm0, %v1214_v6 }
 0x316   :  { %v621_v61 = vpop.f32.mrf.mxu0 }
 0x31e   :  { %v624_v55 = vpop.f32.mrf.mxu0 }
 0x360   :  { %v695_v57 = vpop.permute.xlu2 %694 }
 0x370   :  { %v683_v27 = vpop.permute.xlu0 %682  ;;  %v689_v54 = vpop.permute.xlu1 %688 }
 0x371   :  { %v685_v31 = vadd.f32 %v683_v27, %v679_v22 }
 0x373   :  { %v691_v56 = vadd.f32 %v689_v54, %v685_v31 }
 0x375   :  { %v697_v28 = vadd.f32 %v695_v57, %v691_v56 }
 0x377   :  { %757 = vrot.lane.b32.xlu0 %v697_v28, %s1059_s21 }
 0x380   :  { %v715_v38 = vpop.f32.mrf.mxu2 }
 0x381   :  { %v727_v1 = vmul.f32 %v715_v38, %v615_v39 }
 0x388   :  { %v718_v60 = vpop.f32.mrf.mxu2 }
 0x389   :  { %v728_v30 = vmul.f32 %v718_v60, %v618_v59 }
 0x390   :  { %v721_v62 = vpop.f32.mrf.mxu2 }
 0x391   :  { %v729_v6 = vmul.f32 %v721_v62, %v621_v61 }
 0x398   :  { %v724_v63 = vpop.f32.mrf.mxu2 }
 0x399   :  { %v730_v0 = vmul.f32 %v724_v63, %v624_v55 }
 0x39b   :  { %743 = vmatpush.msrb.mxu1 %v730_v0 }
 0x39d   :  { %744 = vmatpush.msrb.mxu1 %v729_v6 }
 0x39f   :  { %745 = vmatpush.msrb.mxu1 %v728_v30 }
 0x3a1   :  { %746 = vmatpush.msrb.mxu1 %v727_v1 }
 0x3a2   :  { %872 = vmatmul.msk.f32.vlgmr.msrb.gmra.mxu1 %vm265_vm1, %v1232_v58 }
 0x3a3   :  { %775 = vmatpush.msra.mxu1 %v876_v2 }
 0x3a5   :  { %776 = vmatpush.msra.mxu1 %v875_v3 }
 0x3a7   :  { %777 = vmatpush.msra.mxu1 %v874_v5 }
 0x3a9   :  { %778 = vmatpush.msra.mxu1 %v873_v7 }
 0x3e9   :  { %v758_v8 = vpop.permute.xlu0 %757 }
 0x41f   :  { %v748_v58 = vpop.f32.mrf.mxu1 }
 0x420   :  { %877 = vmatmul.msk.f32.vlgmr.msra.gmra.mxu1 %vm265_vm1, %v748_v58 }
 0x49d   :  { %v780_v9 = vpop.f32.mrf.mxu1 }
 0x49e   :  { %v781_v4 = vadd.f32 %v780_v9, %v758_v8 }
 0x4a0   :  { %v783_v10 = vand.u32 2147483647, %v781_v4 }
 0x4a2   :  { %v784_v12 = vmax.f32 %v783_v10, 1e-08 }
 0x4a4   :  { %v790_v17 = vadd.f32 %v901_v11, %v784_v12 }
 0x4a6   :  { %v794_v13 = vand.u32 2147483647, %v790_v17  ;;  %v791_v26 = vmax.f32 %v790_v17, 0.0  ;;  %vm792_vm8 = vcmp.ne.f32.partialorder %v790_v17, %v790_v17 }
 0x4a8   :  { %v795_v18 = vsub.f32 0.0, %v794_v13 }
 0x4aa   :  { %v796_v14 = vmul.f32 1.442695, %v795_v18 }
 0x4ac   :  { %940 = vpow2.f32 %v796_v14 }
 0x4b2   :  { %v941_v15 = vpop.eup %940 }
 0x4b3   :  { %v798_v16 = vadd.f32 1.0, %v941_v15  ;;  %v801_v19 = vmul.f32 -0.5, %v941_v15  ;;  %v804_v21 = vand.u32 2147483647, %v941_v15 }
 0x4b5   :  { %942 = vlog2.f32 %v798_v16  ;;  %v802_v20 = vadd.f32 1.0, %v801_v19  ;;  %vm805_vm0 = vcmp.lt.f32.partialorder %v804_v21, 0.0004427343 }
 0x4b6   :  { %944 = vrcp.f32 %v784_v12 }
 0x4b7   :  { %v803_v25 = vmul.f32 %v941_v15, %v802_v20 }
 0x4bb   :  { %v943_v23 = vpop.eup %942 }
 0x4bc   :  { %v800_v24 = vmul.f32 0.6931472, %v943_v23  ;;  %v945_v35 = vpop.eup %944 }
 0x4be   :  { %v806_v29 = vsel %vm805_vm0, %v803_v25, %v800_v24 }
 0x4bf   :  { %v807_v32 = vadd.f32 %v806_v29, %v791_v26 }
 0x4c1   :  { %v808_v33 = vsel %vm792_vm8, %v790_v17, %v807_v32 }
 0x4c2   :  { %v879_v34 = vadd.f32 -0.6931472, %v808_v33 }
 0x4c4   :  { %v811_v36 = vmul.f32 %v945_v35, %v879_v34 }
 0x4c6   :  { %v812_v37 = vmul.f32 %v811_v36, %v781_v4 }
 0x4c8   :  { %813 = vst.msk [vmem:[#allocation8] sm:$0xff] %vm265_vm1, %v812_v37 }
 0x4c9   :  { %824 = dma.vmem_to_hbm [thread:$0]  %s820_s9, 128, %s822_s6, [#allocation4]  }
 0x4ca   :  { %1046 = dma.done.wait [#allocation4], 128  }
 0x4cb   :  { %1047 = vsyncadd [#allocation4], 4294967168 }
 0x4cc   :  { %829 = vsyncpa [#allocation3], 1 }
 0x4cd   :  { %830 = vsyncpa [#allocation6], 1 }
 0x4ce   :  { %831 = vsyncpa [#allocation4], 1 }

</bundles_post_ra>
